<compile_context>
chip_gen: v6e
topology: v6e:2x2x1
jax: 0.10.0
libtpu: 0.0.40
codegen_flags: <defaults>
</compile_context>

<pallas_src>
import numpy as np
import jax
import jax.numpy as jnp
from jax.experimental import pallas as pl
from jax.experimental.pallas import tpu as pltpu


def _round_up(x, m):
    return ((x + m - 1) // m) * m


# ----------------------------------------------------------------------------
# librosa-style (Slaney) mel filterbank, computed deterministically in numpy.
# ----------------------------------------------------------------------------
def _hz_to_mel(freq):
    freq = np.asarray(freq, dtype=np.float64)
    f_sp = 200.0 / 3.0
    mels = freq / f_sp
    min_log_hz = 1000.0
    min_log_mel = min_log_hz / f_sp
    logstep = np.log(6.4) / 27.0
    return np.where(
        freq >= min_log_hz,
        min_log_mel + np.log(np.maximum(freq, 1e-10) / min_log_hz) / logstep,
        mels,
    )


def _mel_to_hz(mels):
    mels = np.asarray(mels, dtype=np.float64)
    f_sp = 200.0 / 3.0
    freqs = f_sp * mels
    min_log_hz = 1000.0
    min_log_mel = min_log_hz / f_sp
    logstep = np.log(6.4) / 27.0
    return np.where(
        mels >= min_log_mel,
        min_log_hz * np.exp(logstep * (mels - min_log_mel)),
        freqs,
    )


def librosa_mel_fn(sr, n_fft, n_mels, fmin, fmax):
    if fmax is None:
        fmax = sr / 2.0
    n_freq = n_fft // 2 + 1
    fftfreqs = np.linspace(0.0, sr / 2.0, n_freq)
    mel_f = _mel_to_hz(np.linspace(_hz_to_mel(fmin), _hz_to_mel(fmax), n_mels + 2))
    fdiff = np.diff(mel_f)
    ramps = mel_f[:, None] - fftfreqs[None, :]
    lower = -ramps[:-2] / fdiff[:-1, None]
    upper = ramps[2:] / fdiff[1:, None]
    weights = np.maximum(0.0, np.minimum(lower, upper))
    enorm = 2.0 / (mel_f[2 : n_mels + 2] - mel_f[:n_mels])
    weights = weights * enorm[:, None]
    return weights.astype(np.float32)  # (n_mels, n_freq)


# ----------------------------------------------------------------------------
# Pallas kernel: one wide windowed-DFT matmul (bf16 in, f32 acc), elementwise
# square, mel matmul (f32), log10(clamp).  All operands lane-dense (x128).
# ----------------------------------------------------------------------------
def _mel_kernel(frames_ref, dft_ref, mel_ref, out_ref):
    f = frames_ref[...]                                                   # (tm, n_fft_pad) bf16
    stft = jnp.dot(f, dft_ref[...], preferred_element_type=jnp.float32)   # (tm, C) = [re | im | 0pad]
    power = stft * stft                                                   # re^2 / im^2 interleaved blocks
    mel = jnp.dot(power, mel_ref[...], preferred_element_type=jnp.float32)  # (tm, n_mel_pad)
    out_ref[...] = jnp.log10(jnp.maximum(mel, 1e-5))


class Audio2MelPallas:
    def __init__(self, n_fft=1024, hop_length=256, win_length=1024,
                 sampling_rate=16000, n_mel_channels=80,
                 mel_fmin=0.0, mel_fmax=None):
        assert win_length <= n_fft
        self.n_fft = n_fft
        self.hop_length = hop_length
        self.win_length = win_length
        self.n_mel_channels = n_mel_channels

        n_freq = n_fft // 2 + 1
        self.n_freq = n_freq
        self.n_fft_pad = _round_up(n_fft, 128)
        self.C = _round_up(2 * n_freq, 128)          # combined re|im width (lane-dense)
        self.n_mel_pad = _round_up(n_mel_channels, 128)

        # hann window (periodic, matching torch.hann_window default),
        # zero-padded/centered to n_fft like torch.stft.
        n = np.arange(win_length, dtype=np.float64)
        win = 0.5 - 0.5 * np.cos(2.0 * np.pi * n / win_length)
        pad_l = (n_fft - win_length) // 2
        window = np.zeros(n_fft, dtype=np.float64)
        window[pad_l : pad_l + win_length] = win

        # Combined windowed DFT matrix: columns [0:n_freq] = w*cos, columns
        # [n_freq:2*n_freq] = -w*sin, rest zero-padded.
        nn = np.arange(n_fft, dtype=np.float64)[:, None]
        kk = np.arange(n_freq, dtype=np.float64)[None, :]
        ang = 2.0 * np.pi * nn * kk / n_fft
        dft_w = np.zeros((self.n_fft_pad, self.C), dtype=np.float32)
        dft_w[:n_fft, :n_freq] = (window[:, None] * np.cos(ang)).astype(np.float32)
        dft_w[:n_fft, n_freq:2 * n_freq] = (window[:, None] * (-np.sin(ang))).astype(np.float32)
        self.dft_w_f32 = jnp.asarray(dft_w)
        self.dft_w = self.dft_w_f32.astype(jnp.bfloat16)     # MXU-native operand

        # Stacked mel basis: rows [0:n_freq] and [n_freq:2*n_freq] both hold
        # mel_T so (re^2 | im^2) @ mel_stacked == (re^2 + im^2) @ mel_T.
        mel_basis = librosa_mel_fn(sampling_rate, n_fft, n_mel_channels,
                                   mel_fmin, mel_fmax)          # (n_mel, n_freq)
        mel_w = np.zeros((self.C, self.n_mel_pad), dtype=np.float32)
        mel_w[:n_freq, :n_mel_channels] = mel_basis.T
        mel_w[n_freq:2 * n_freq, :n_mel_channels] = mel_basis.T
        self.mel_w = jnp.asarray(mel_w)

    # --- glue: reflect pad + overlapped framing (shared by kernel & refs) ---
    def _frame(self, audioin):
        B, C_in, T = audioin.shape
        assert C_in == 1
        p = (self.n_fft - self.hop_length) // 2
        audio = jnp.pad(audioin, ((0, 0), (0, 0), (p, p)), mode="reflect")[:, 0, :]
        Tp = audio.shape[-1]
        n_frames = 1 + (Tp - self.n_fft) // self.hop_length
        idx = (jnp.arange(n_frames)[:, None] * self.hop_length
               + jnp.arange(self.n_fft)[None, :])
        frames = audio[:, idx]                                   # (B, n_frames, n_fft)
        frames = frames.reshape(B * n_frames, self.n_fft).astype(jnp.float32)
        if self.n_fft_pad != self.n_fft:
            frames = jnp.pad(frames, ((0, 0), (0, self.n_fft_pad - self.n_fft)))
        return frames, n_frames

    def __call__(self, audioin):
        # audioin: (B, 1, T) float32, same as the PyTorch module.
        B = audioin.shape[0]
        frames, n_frames = self._frame(audioin)                  # (M, n_fft_pad) f32
        M = frames.shape[0]

        # Row tile: big (256) to feed the MXU; pad M with zero frames rather
        # than shrinking the tile.  For tiny inputs split into two tiles so a
        # 2-TensorCore chip (v7x) can still shard the "parallel" axis.
        if M >= 2 * 256:
            tm = 256
        else:
            tm = max(8, _round_up(pl.cdiv(M, 2), 8))
        M_pad = _round_up(M, tm)
        if M_pad != M:
            frames = jnp.pad(frames, ((0, M_pad - M), (0, 0)))
        frames = frames.astype(jnp.bfloat16)                     # halve HBM/VMEM traffic
        grid = (M_pad // tm,)

        flops = 2 * M_pad * self.n_fft_pad * self.C + 2 * M_pad * self.C * self.n_mel_pad
        bytes_accessed = (M_pad * self.n_fft_pad * 2          # bf16 frames
                          + self.n_fft_pad * self.C * 2       # bf16 DFT weight
                          + self.C * self.n_mel_pad * 4       # f32 mel weight
                          + M_pad * self.n_mel_pad * 4)       # f32 output

        out = pl.pallas_call(
            _mel_kernel,
            out_shape=jax.ShapeDtypeStruct((M_pad, self.n_mel_pad), jnp.float32),
            grid=grid,
            in_specs=[
                pl.BlockSpec((tm, self.n_fft_pad), lambda i: (i, 0)),
                pl.BlockSpec((self.n_fft_pad, self.C), lambda i: (0, 0)),
                pl.BlockSpec((self.C, self.n_mel_pad), lambda i: (0, 0)),
            ],
            out_specs=pl.BlockSpec((tm, self.n_mel_pad), lambda i: (i, 0)),
            compiler_params=pltpu.CompilerParams(
                dimension_semantics=("parallel",),
                vmem_limit_bytes=32 * 1024 * 1024),
            cost_estimate=pl.CostEstimate(flops=flops,
                                          transcendentals=M_pad * self.n_mel_pad,
                                          bytes_accessed=bytes_accessed),
        )(frames, self.dft_w, self.mel_w)

        # Drop padded rows / padded mel channels, back to (B, n_mel, n_frames).
        out = out[:M, :self.n_mel_channels]
        return out.reshape(B, n_frames, self.n_mel_channels).transpose(0, 2, 1)

    # Pure-JAX reference with the SAME bf16 quantization as the kernel
    # (validates the Pallas kernel itself, tight tolerance).
    def reference(self, audioin):
        B = audioin.shape[0]
        frames, n_frames = self._frame(audioin)
        fb = frames.astype(jnp.bfloat16)
        stft = jnp.dot(fb, self.dft_w, preferred_element_type=jnp.float32)
        power = stft * stft
        mel = jnp.dot(power, self.mel_w, preferred_element_type=jnp.float32)
        out = jnp.log10(jnp.maximum(mel, 1e-5))[:, :self.n_mel_channels]
        return out.reshape(B, n_frames, self.n_mel_channels).transpose(0, 2, 1)

    # Pure-JAX float32 reference (the original module's math, loose tolerance
    # documents the bf16-input precision tradeoff).
    def reference_f32(self, audioin):
        B = audioin.shape[0]
        frames, n_frames = self._frame(audioin)
        stft = jnp.dot(frames, self.dft_w_f32, preferred_element_type=jnp.float32)
        power = stft * stft
        mel = jnp.dot(power, self.mel_w, preferred_element_type=jnp.float32)
        out = jnp.log10(jnp.maximum(mel, 1e-5))[:, :self.n_mel_channels]
        return out.reshape(B, n_frames, self.n_mel_channels).transpose(0, 2, 1)


if __name__ == "__main__":
    # Small shapes consistent with the module's constructor arguments.
    n_fft, hop, win, n_mels, sr = 256, 64, 256, 32, 16000
    B, T = 2, 1024

    model = Audio2MelPallas(n_fft=n_fft, hop_length=hop, win_length=win,
                            sampling_rate=sr, n_mel_channels=n_mels,
                            mel_fmin=0.0, mel_fmax=None)

    key = jax.random.PRNGKey(0)
    audio = jax.random.normal(key, (B, 1, T), dtype=jnp.float32) * 0.1

    log_mel = model(audio)
    jax.block_until_ready(log_mel)

    # Tight check against the matched-precision reference (same bf16 inputs).
    ref = model.reference(audio)
    np.testing.assert_allclose(np.asarray(log_mel), np.asarray(ref),
                               rtol=2e-3, atol=2e-3)

    # Loose sanity check against full-f32 math of the original module.
    ref32 = model.reference_f32(audio)
    np.testing.assert_allclose(np.asarray(log_mel), np.asarray(ref32),
                               rtol=5e-2, atol=5e-2)

    expected_frames = 1 + (T + 2 * ((n_fft - hop) // 2) - n_fft) // hop
    assert log_mel.shape == (B, n_mels, expected_frames)
    print("KERNEL_OK")
</pallas_src>

<mosaic_0001>
module attributes {stable_mosaic.version = 11 : i64} {
  func.func @_mel_kernel(%arg0: i32, %arg1: memref<16x256xbf16, #tpu.memory_space<vmem>>, %arg2: memref<256x384xbf16, #tpu.memory_space<vmem>>, %arg3: memref<384x128xf32, #tpu.memory_space<vmem>>, %arg4: memref<16x128xf32, #tpu.memory_space<vmem>>) attributes {dimension_semantics = [#tpu.dimension_semantics<parallel>], iteration_bounds = array<i64: 2>, scalar_prefetch = 0 : i64, scratch_operands = 0 : i64, tpu.core_type = #tpu.core_type<tc>, window_params = [{transform_indices = @transform_0, window_bounds = array<i64: 16, 256>}, {pipeline_mode = #tpu.pipeline_mode<synchronous>, transform_indices = @transform_1, window_bounds = array<i64: 256, 384>}, {pipeline_mode = #tpu.pipeline_mode<synchronous>, transform_indices = @transform_2, window_bounds = array<i64: 384, 128>}, {transform_indices = @transform_3, window_bounds = array<i64: 16, 128>}]} {
    %c0 = arith.constant 0 : index
    %c0_0 = arith.constant 0 : index
    %0 = vector.load %arg1[%c0, %c0_0] : memref<16x256xbf16, #tpu.memory_space<vmem>>, vector<16x256xbf16>
    %c0_1 = arith.constant 0 : index
    %c0_2 = arith.constant 0 : index
    %1 = vector.load %arg2[%c0_1, %c0_2] : memref<256x384xbf16, #tpu.memory_space<vmem>>, vector<256x384xbf16>
    %cst = arith.constant dense<0.000000e+00> : vector<16x384xf32>
    %2 = tpu.matmul %0, %1, %cst {dimension_numbers = #tpu.dot_dimension_numbers<[1], [0], [0], [1], [0, 0, 1, 1], [], []>} : vector<16x256xbf16>, vector<256x384xbf16>, vector<16x384xf32> -> vector<16x384xf32>
    %3 = arith.mulf %2, %2 : vector<16x384xf32>
    %c0_3 = arith.constant 0 : index
    %c0_4 = arith.constant 0 : index
    %4 = vector.load %arg3[%c0_3, %c0_4] : memref<384x128xf32, #tpu.memory_space<vmem>>, vector<384x128xf32>
    %cst_5 = arith.constant dense<0.000000e+00> : vector<16x128xf32>
    %5 = tpu.matmul %3, %4, %cst_5 {dimension_numbers = #tpu.dot_dimension_numbers<[1], [0], [0], [1], [0, 0, 1, 1], [], []>} : vector<16x384xf32>, vector<384x128xf32>, vector<16x128xf32> -> vector<16x128xf32>
    %cst_6 = arith.constant 9.99999974E-6 : f32
    %6 = vector.broadcast %cst_6 : f32 to vector<16x128xf32>
    %7 = arith.maximumf %5, %6 : vector<16x128xf32>
    %8 = math.log %7 : vector<16x128xf32>
    %cst_7 = arith.constant 0.434294492 : f32
    %9 = vector.broadcast %cst_7 : f32 to vector<16x128xf32>
    %10 = arith.mulf %8, %9 : vector<16x128xf32>
    %c0_8 = arith.constant 0 : index
    %c0_9 = arith.constant 0 : index
    %11 = vector.load %arg4[%c0_8, %c0_9] : memref<16x128xf32, #tpu.memory_space<vmem>>, vector<16x128xf32>
    tpu.vector_store %arg4[%c0_8, %c0_9], %10 {strides = array<i32>} : memref<16x128xf32, #tpu.memory_space<vmem>>, vector<16x128xf32>,
    return
  }
  func.func @transform_0(%arg0: i32) -> (i32, i32) {
    %c0_i32 = arith.constant 0 : i32
    %c0_i32_0 = arith.constant 0 : i32
    return %arg0, %c0_i32 : i32, i32
  }
  func.func @transform_1(%arg0: i32) -> (i32, i32) {
    %c0_i32 = arith.constant 0 : i32
    %c0_i32_0 = arith.constant 0 : i32
    %c0_i32_1 = arith.constant 0 : i32
    return %c0_i32, %c0_i32_0 : i32, i32
  }
  func.func @transform_2(%arg0: i32) -> (i32, i32) {
    %c0_i32 = arith.constant 0 : i32
    %c0_i32_0 = arith.constant 0 : i32
    %c0_i32_1 = arith.constant 0 : i32
    return %c0_i32, %c0_i32_0 : i32, i32
  }
  func.func @transform_3(%arg0: i32) -> (i32, i32) {
    %c0_i32 = arith.constant 0 : i32
    %c0_i32_0 = arith.constant 0 : i32
    return %arg0, %c0_i32 : i32, i32
  }
}

</mosaic_0001>

<bundles_post_ra>
// kernel: tpu_custom_call.1
= control target key start
LH: loop header
LB: loop body
LE: loop exit
PB: predicated region body
PF: predicated region fallthrough
CT: control target
= control target key end

     0   :  { %8 = vsyncpa [#allocation3], 0  ;;  %s1669_s0 = inlined_call_operand.hbm [shape: bf16[32,256], index: 0, kind: input, shape index: {}]   ;;  %s1670_s1 = inlined_call_operand.hbm [shape: bf16[256,384], index: 1, kind: input, shape index: {}]   ;;  %s1671_s2 = inlined_call_operand.hbm [shape: f32[384,128], index: 2, kind: input, shape index: {}]   ;;  %s1672_s3 = inlined_call_operand.hbm [shape: f32[32,128], index: 3, kind: output, shape index: {}]  }
   0x1   :  { %10 = vsyncpa [#allocation3 + $0x1], 0 }
   0x2   :  { %11 = vsyncpa [#allocation6], 0 }
   0x3   :  { %12 = vsyncpa [#allocation4], 0 }
   0x4   :  { %14 = vsyncpa [#allocation4 + $0x1], 0  ;;  %s1467_s12 = smov 0   ;;  %s1469_s13 = smov 0  }
   0x5   :  { %s1471_s14 = smov 0   ;;  %s1473_s15 = smov 0  }
   0x6 LB: > { %s1488_s16 = sadd.s32 4294967295, %s1435_s15   ;;  %s958_s17 = sadd.s32 4294967294, %s1435_s15   ;;  %s1435_s15 = sphi %s1473_s15, %s1694_s15   ;;  %s1431_s14 = sphi %s1471_s14, %s1693_s14   ;;  %s1427_s13 = sphi %s1469_s13, %s1692_s13   ;;  %s1423_s12 = sphi %s1467_s12, %s1691_s12  }
   0x7   : > { %p40_p0 = scmp.ne.s32.totalorder %s1427_s13, %s1423_s12  ;;  %p1673_p1 = scmp.eq.s32.totalorder %s1488_s16, 0 }
   0x8   : > { %p112_p3 = scmp.eq.s32.totalorder %s958_s17, 1  ;;  %p959_p5 = scmp.ge.s32.totalorder %s1435_s15, 1 }
   0x9   : > { %p1497_p4 = por %p1673_p1, %p40_p0  ;;  %p119_p7 = scmp.lt.s32.totalorder %s1435_s15, 3 }
   0xa   : > { %p1502_p6 = por %p112_p3, %p40_p0  ;;  %s1437_s21 = smov [#allocation5]  }
   0xb   : > { %s1677_s18 = scalar_select %p1497_p4, 1, 0 }
   0xc   : > { %s1678_s19 = scalar_select %p1502_p6, 1, 0 }
   0xd   : > { %p1507_p8 = pnand %p959_p5, %p119_p7  ;;  %s131_s22 = sshll.u32 %s1437_s21, 4  ;;  %s132_s22 = int_to_ptr.vmem [resolvable:$true] %s131_s22 }
   0xe   : > { %s1438_s24 = smov [#allocation7]   ;;  %s1298_s26 = scalar_lea.vmem %s132_s22, 6144 }
   0xf   : > { %s1679_s20 = scalar_select %p1507_p8, 1, 0 }
  0x10   : > { %p1155_p9 = pneg %p1507_p8  ;;  %s144_s25 = sshll.u32 %s1438_s24, 4  ;;  %s145_s25 = int_to_ptr.vmem [resolvable:$true] %s144_s25 }
  0x11   : > { %p1299_p13 = scmp.ne.s32.totalorder %s132_s22, %s1298_s26  ;;  %p1306_p5 = scmp.lt.s32.totalorder %s132_s22, %s132_s22 }
  0x12   : > { %p1516_p11 = pnand %p1155_p9, %p1673_p1  ;;  %p1307_p7 = scmp.lt.s32.totalorder %s1298_s26, %s1298_s26 }
  0x14   : > { %p1289_p12 = pneg %p1516_p11  ;;  %p1308_p10 = por %p1307_p7, %p1306_p5 }
  0x16   : > { %p1301_p0 = pnand %p1299_p13, %p1289_p12 }
  0x18   : > { %p1302_p3 = pneg %p1301_p0 }
  0x1a   : > { %p1309_p9 = pnand %p1308_p10, %p1302_p3 }
  0x1c   : > { %1312 = shalt.err (!%p1309_p9)
}
  0x1d   : > { %s1439_s27 = smov 192   ;;  %s1440_s28 = smov 12  }
  0x1e   : > { %1158 = dma.hbm_to_vmem [thread:$0]  (!%p1516_p11), %s1670_s1, 6144, %s132_s22, [#allocation6], %s1439_s27, %s1439_s27, %s1440_s28  }
  0x1f   : > { %s1324_s4 = scalar_lea.vmem %s145_s25, 6144  ;;  %p1332_p2 = scmp.lt.s32.totalorder %s145_s25, %s145_s25 }
  0x20   : > { %p1325_p1 = scmp.ne.s32.totalorder %s145_s25, %s1324_s4  ;;  %p1333_p6 = scmp.lt.s32.totalorder %s1324_s4, %s1324_s4 }
  0x22   : > { %p1327_p13 = pnand %p1325_p1, %p1289_p12  ;;  %p1334_p5 = por %p1333_p6, %p1332_p2 }
  0x24   : > { %p1328_p0 = pneg %p1327_p13 }
  0x26   : > { %p1335_p10 = pnand %p1334_p5, %p1328_p0 }
  0x28   : > { %1338 = shalt.err (!%p1335_p10)
}
  0x29   : > { %s1441_s5 = smov 128   ;;  %s1442_s6 = smov 8  }
  0x2a   : > { %1161 = dma.hbm_to_vmem [thread:$0]  (!%p1516_p11), %s1671_s2, 6144, %s145_s25, [#allocation6], %s1441_s5, %s1441_s5, %s1442_s6  }
  0x2b   : > { %s1542_s9 = sadd.s32 1, %s1435_s15   ;;  %s27_s11 = sadd.s32 1, %s1431_s14 }
  0x2c   : > { %s24_s10 = ssub.s32 %s1435_s15, %s1542_s9  ;;  %p34_p2 = scmp.ne.s32.totalorder %s1431_s14, %s1427_s13 }
  0x2d   : > { %p25_p1 = scmp.eq.s32.totalorder %s24_s10, 0  ;;  %p35_p6 = scmp.eq.s32.totalorder %s1435_s15, 0 }
  0x2e   : > { %p1681_p3 = scmp.eq.s32.totalorder %s1488_s16, 1  ;;  %p1172_p9 = scmp.lt.s32.totalorder %s1435_s15, 2 }
  0x2f   : > { %s1551_s17 = scalar_select %p25_p1, %s1431_s14, %s27_s11  }
  0x30   : > { %p36_p12 = por %p35_p6, %p34_p2  ;;  %p1555_p7 = por %p1681_p3, %p34_p2 }
  0x31   : > { %s158_s22 = sand.u32 1, %s1431_s14   ;;  %s1028_s24 = sshll.u32 %s1435_s15, 8 }
  0x32   : > { %s1682_s21 = scalar_select %p1555_p7, 1, 0 }
  0x33   : > { %s963_s23 = sshll.u32 %s158_s22, 4  ;;  %s1565_s27 = scalar_lea.hbm %s1669_s0, %s1028_s24 }
  0x34   : > { %s162_s28 = scalar_lea.vmem [#allocation2], %s963_s23  ;;  %p1569_p11 = pnand %p1172_p9, %p36_p12 }
  0x35   : > { %s170_s29 = sshll.u32 %s162_s28, 4  ;;  %s1573_s4 = scalar_lea.sflag [#allocation3], %s158_s22  ;;  %s1567_s29 = int_to_ptr.vmem [resolvable:$true] %s170_s29 }
  0x36   : > { %s1339_s7 = scalar_lea.hbm %s1565_s27, 256  ;;  %p1341_p0 = pneg %p1569_p11 }
  0x37   : > { %p1340_p13 = scmp.ne.s32.totalorder %s1565_s27, %s1339_s7  ;;  %s1344_s11 = scalar_lea.hbm %s1669_s0, 512 }
  0x38   : > { %p1345_p1 = scmp.lt.s32.totalorder %s1565_s27, %s1669_s0  ;;  %p1346_p2 = scmp.lt.s32.totalorder %s1344_s11, %s1339_s7 }
  0x39   : > { %p1342_p5 = pnand %p1341_p0, %p1340_p13 }
  0x3a   : > { %p1347_p6 = por %p1346_p2, %p1345_p1 }
  0x3b   : > { %p1343_p10 = pneg %p1342_p5 }
  0x3d   : > { %p1348_p12 = pnand %p1347_p6, %p1343_p10 }
  0x3f   : > { %1351 = shalt.err (!%p1348_p12)
}
  0x40   : > { %s1352_s22 = scalar_lea.vmem %s1567_s29, 256  ;;  %s1443_s25 = smov [#allocation2]  }
  0x41   : > { %p1353_p3 = scmp.ne.s32.totalorder %s1567_s29, %s1352_s22  ;;  %s1357_s26 = sshll.u32 %s1443_s25, 4  ;;  %s1358_s26 = int_to_ptr.vmem [resolvable:$false] %s1357_s26 }
  0x42   : > { %s1359_s28 = scalar_lea.vmem %s1358_s26, 512  ;;  %p1360_p5 = scmp.lt.s32.totalorder %s1567_s29, %s1358_s26 }
  0x43   : > { %p1355_p9 = pnand %p1353_p3, %p1341_p0  ;;  %p1361_p7 = scmp.lt.s32.totalorder %s1359_s28, %s1352_s22 }
  0x45   : > { %p1356_p13 = pneg %p1355_p9  ;;  %p1362_p4 = por %p1361_p7, %p1360_p5 }
  0x47   : > { %p1363_p8 = pnand %p1362_p4, %p1356_p13 }
  0x49   : > { %1366 = shalt.err (!%p1363_p8)
}
  0x4a   : > { %1165 = dma.hbm_to_vmem [thread:$0]  (!%p1569_p11), %s1565_s27, 256, %s1567_s29, %s1573_s4, %s1441_s5, %s1441_s5, %s1442_s6  }
  0x4b   : > { %p1684_p0 = scmp.ne.s32.totalorder %s1679_s20, 0 }
  0x4c   : > { %s1600_s7 = sand.u32 (!%p1684_p0), 1, %s1427_s13   ;;  %p1685_p4 = scmp.ne.s32.totalorder (!%p1684_p0), %s1677_s18, 0 }
  0x4d   : > { %182 = sbr.rel (%p1684_p0) target bundleno = 586 (0x24a), region = 32  ;;  %s968_s8 = sshll.u32 (!%p1684_p0), %s1600_s7, 4 }
  0x4e   : > { %s185_s10 = scalar_lea.sflag (!%p1684_p0), [#allocation3], %s1600_s7  ;;  %s1606_s30 = scalar_lea.vmem (!%p1684_p0), [#allocation2], %s968_s8 }
  0x52   : > { %1410 = dma.done.wait (%p1685_p4), %s185_s10, 256  }
  0x53   : > { %1412 = vsyncadd (%p1685_p4), %s185_s10, 4294967040  ;;  %p1686_p8 = scmp.eq.s32.totalorder %s1488_s16, 0 }
  0x55   : > { %1414 = dma.done.wait (%p1686_p8), [#allocation6], 12288   ;;  %p1687_p7 = pmov %p1686_p8 }
  0x56   : > { %v1216_v0 = vld [vmem:[#allocation5 + $0xac] ss:$12 sps:$4 sm:$0xff]   ;;  %v1218_v1 = vld [vmem:[#allocation5 + $0xa8] ss:$12 sps:$4 sm:$0xff]   ;;  %v1221_v3 = vld [vmem:[#allocation5 + $0x90] ss:$12 sps:$4 sm:$0xff]  }
  0x57   : > { %1416 = vsyncadd (%p1687_p7), [#allocation6], 4294955008  ;;  %554 = vmatprep.subr.bf16.mxu0 %v1216_v0  ;;  %v1219_v2 = vld [vmem:[#allocation5 + $0x94] ss:$12 sps:$4 sm:$0xff]   ;;  %v1222_v4 = vld [vmem:[#allocation5 + $0x7c] ss:$12 sps:$4 sm:$0xff]  }
  0x58   : > { %555 = vmatpush1.bf16.msra.mxu0 %v1218_v1  ;;  %v1224_v5 = vld [vmem:[#allocation5 + $0x78] ss:$12 sps:$4 sm:$0xff]   ;;  %v1227_v7 = vld [vmem:[#allocation5 + $0x60] ss:$12 sps:$4 sm:$0xff]   ;;  %v1237_v8 = vld [vmem:[#allocation5 + $0x170] ss:$12 sps:$4 sm:$0xff]  }
  0x59   : > { %556 = vmatprep.subr.bf16.mxu0 %v1219_v2  ;;  %v1225_v6 = vld [vmem:[#allocation5 + $0x64] ss:$12 sps:$4 sm:$0xff]   ;;  %v1228_v10 = vld [vmem:[#allocation5 + $0x4c] ss:$12 sps:$4 sm:$0xff]   ;;  %1030 = vmatprep.subr.bf16.mxu1 %v1237_v8  ;;  %v1230_v13 = vld [vmem:[#allocation5 + $0x48] ss:$12 sps:$4 sm:$0xff]  }
  0x5a   : > { %v1238_v9 = vld [vmem:[#allocation5 + $0xb0] ss:$12 sps:$4 sm:$0xff]   ;;  %v1242_v11 = vld [vmem:[#allocation5 + $0x158] ss:$12 sps:$4 sm:$0xff]   ;;  %v1231_v14 = vld [vmem:[#allocation5 + $0x34] ss:$12 sps:$4 sm:$0xff]  }
  0x5b   : > { %1031 = vmatpush3.bf16.msra.mxu1 %v1238_v9  ;;  %v1243_v12 = vld [vmem:[#allocation5 + $0x98] ss:$12 sps:$4 sm:$0xff]   ;;  %v1247_v15 = vld [vmem:[#allocation5 + $0x140] ss:$12 sps:$4 sm:$0xff]   ;;  %v1233_v17 = vld [vmem:[#allocation5 + $0x30] ss:$12 sps:$4 sm:$0xff]  }
  0x5c   : > { %557 = vmatpush1.bf16.msra.mxu0 %v1221_v3  ;;  %1032 = vmatprep.subr.bf16.mxu1 %v1242_v11  ;;  %v1248_v16 = vld [vmem:[#allocation5 + $0x80] ss:$12 sps:$4 sm:$0xff]   ;;  %v1234_v18 = vld [vmem:[#allocation5 + $0x1c] ss:$12 sps:$4 sm:$0xff]   ;;  %v1236_v21 = vld [vmem:[#allocation5 + $0x18] ss:$12 sps:$4 sm:$0xff]  }
  0x5d   : > { %558 = vmatprep.subr.bf16.mxu0 %v1222_v4  ;;  %v1252_v19 = vld [vmem:[#allocation5 + $0x128] ss:$12 sps:$4 sm:$0xff]   ;;  %v1257_v22 = vld [vmem:[#allocation5 + $0x110] ss:$12 sps:$4 sm:$0xff]   ;;  %v1262_v25 = vld [vmem:[#allocation5 + $0xf8] ss:$12 sps:$4 sm:$0xff]  }
  0x5e   : > { %v1253_v20 = vld [vmem:[#allocation5 + $0x68] ss:$12 sps:$4 sm:$0xff]   ;;  %v1239_v23 = vld [vmem:[#allocation5 + $0x4] ss:$12 sps:$4 sm:$0xff]   ;;  %v1241_v26 = vld [vmem:[#allocation5] ss:$12 sps:$4 sm:$0xff]  }
  0x5f   : > { %1033 = vmatpush3.bf16.msra.mxu1 %v1243_v12  ;;  %v1258_v24 = vld [vmem:[#allocation5 + $0x50] ss:$12 sps:$4 sm:$0xff]   ;;  %v1244_v27 = vld [vmem:[#allocation5 + $0x16c] ss:$12 sps:$4 sm:$0xff]   ;;  %v1246_v30 = vld [vmem:[#allocation5 + $0x168] ss:$12 sps:$4 sm:$0xff]  }
  0x60   : > { %559 = vmatpush1.bf16.msra.mxu0 %v1224_v5  ;;  %1034 = vmatprep.subr.bf16.mxu1 %v1247_v15  ;;  %v1263_v28 = vld [vmem:[#allocation5 + $0x38] ss:$12 sps:$4 sm:$0xff]   ;;  %v1267_v29 = vld [vmem:[#allocation5 + $0xe0] ss:$12 sps:$4 sm:$0xff]   ;;  %v1272_v33 = vld [vmem:[#allocation5 + $0xc8] ss:$12 sps:$4 sm:$0xff]  }
  0x61   : > { %560 = vmatprep.subr.bf16.mxu0 %v1225_v6  ;;  %v1249_v31 = vld [vmem:[#allocation5 + $0x154] ss:$12 sps:$4 sm:$0xff]   ;;  %v1251_v34 = vld [vmem:[#allocation5 + $0x150] ss:$12 sps:$4 sm:$0xff]   ;;  %v1256_v38 = vld [vmem:[#allocation5 + $0x138] ss:$12 sps:$4 sm:$0xff]  }
  0x62   : > { %v1268_v32 = vld [vmem:[#allocation5 + $0x20] ss:$12 sps:$4 sm:$0xff]   ;;  %v1254_v35 = vld [vmem:[#allocation5 + $0x13c] ss:$12 sps:$4 sm:$0xff]   ;;  %v1259_v40 = vld [vmem:[#allocation5 + $0x124] ss:$12 sps:$4 sm:$0xff]  }
  0x63   : > { %1035 = vmatpush3.bf16.msra.mxu1 %v1248_v16  ;;  %v1278_v36 = vld [vmem:[%s1606_s30 + $0x4] ss:$8 sps:$4 sm:$0xff]   ;;  %v1276_v41 = vld [vmem:[%s1606_s30] ss:$8 sps:$4 sm:$0xff]   ;;  %s1029_s18 = sshll.u32 %s1488_s16, 8  ;;  %s218_s20 = scalar_lea.vmem [#allocation8], %s968_s8 }
  0x64   : > { %561 = vmatpush1.bf16.msra.mxu0 %v1227_v7  ;;  %1036 = vmatprep.subr.bf16.mxu1 %v1252_v19  ;;  %v1273_v37 = vld [vmem:[#allocation5 + $0x8] ss:$12 sps:$4 sm:$0xff]   ;;  %v675_v39 = vld [vmem:[#allocation7 + $0xf8] sm:$0xff]  ;;  %v1261_v43 = vld [vmem:[#allocation5 + $0x120] ss:$12 sps:$4 sm:$0xff]   ;;  %s866_s5 = sshll.u32 %s218_s20, 4  ;;  %s1624_s29 = scalar_lea.hbm %s1672_s3, %s1029_s18  ;;  %s1626_s5 = int_to_ptr.vmem [resolvable:$true] %s866_s5 }
  0x65   : > { %562 = vmatprep.subr.bf16.mxu0 %v1228_v10  ;;  %629 = vmatprep.mubr.bf16.mxu1 %v1278_v36  ;;  %v659_v42 = vld [vmem:[#allocation7 + $0x78] sm:$0xff]  ;;  %v674_v44 = vld [vmem:[#allocation7 + $0xf0] sm:$0xff]  ;;  %v673_v47 = vld [vmem:[#allocation7 + $0xe8] sm:$0xff]  ;;  %s853_s4 = scalar_lea.sflag [#allocation4], %s1600_s7  ;;  %s1367_s16 = scalar_lea.vmem %s1626_s5, 256 }
  0x66   : > { %586 = vmatprep.mubr.bf16.mxu0 %v1278_v36  ;;  %v1264_v45 = vld [vmem:[#allocation5 + $0x10c] ss:$12 sps:$4 sm:$0xff]   ;;  %v658_v46 = vld [vmem:[#allocation7 + $0x70] sm:$0xff]  ;;  %v672_v50 = vld [vmem:[#allocation7 + $0xe0] sm:$0xff]  ;;  %p1368_p11 = scmp.ne.s32.totalorder %s1626_s5, %s1367_s16  ;;  %p1688_p10 = scmp.ne.s32.totalorder %s1682_s21, 0 }
  0x67   : > { %1037 = vmatpush3.bf16.msra.mxu1 %v1253_v20  ;;  %v657_v48 = vld [vmem:[#allocation7 + $0x68] sm:$0xff]  ;;  %v1269_v51 = vld [vmem:[#allocation5 + $0xf4] ss:$12 sps:$4 sm:$0xff]   ;;  %v671_v53 = vld [vmem:[#allocation7 + $0xd8] sm:$0xff]  ;;  %s1444_s11 = smov [#allocation8]  }
  0x68   : > { %563 = vmatpush1.bf16.msra.mxu0 %v1230_v13  ;;  %1038 = vmatprep.subr.bf16.mxu1 %v1257_v22  ;;  %v1266_v49 = vld [vmem:[#allocation5 + $0x108] ss:$12 sps:$4 sm:$0xff]   ;;  %v656_v52 = vld [vmem:[#allocation7 + $0x60] sm:$0xff]  ;;  %v655_v54 = vld [vmem:[#allocation7 + $0x58] sm:$0xff]  ;;  %p1369_p1 = pnand %p1368_p11, %p1688_p10  ;;  %s1371_s23 = sshll.u32 %s1444_s11, 4  ;;  %s1372_s23 = int_to_ptr.vmem [resolvable:$false] %s1371_s23 }
  0x69   : > { %564 = vmatprep.subr.bf16.mxu0 %v1231_v14  ;;  %v1271_v55 = vld [vmem:[#allocation5 + $0xf0] ss:$12 sps:$4 sm:$0xff]   ;;  %v669_v59 = vld [vmem:[#allocation7 + $0xc8] sm:$0xff]  ;;  %v1279_v61 = vld [vmem:[#allocation5 + $0xd8] ss:$12 sps:$4 sm:$0xff]   ;;  %s1373_s24 = scalar_lea.vmem %s1372_s23, 512  ;;  %p1374_p6 = scmp.lt.s32.totalorder %s1626_s5, %s1372_s23 }
  0x6a   : > { %v670_v56 = vld [vmem:[#allocation7 + $0xd0] sm:$0xff]  ;;  %v1274_v57 = vld [vmem:[#allocation5 + $0xdc] ss:$12 sps:$4 sm:$0xff]   ;;  %v668_v62 = vld [vmem:[#allocation7 + $0xc0] sm:$0xff]  ;;  %p1370_p2 = pneg %p1369_p1  ;;  %p1375_p12 = scmp.lt.s32.totalorder %s1373_s24, %s1367_s16 }
  0x6b   : > { %1039 = vmatpush3.bf16.msra.mxu1 %v1258_v24  ;;  %v654_v58 = vld [vmem:[#allocation7 + $0x50] sm:$0xff]  ;;  %v653_v60 = vld [vmem:[#allocation7 + $0x48] sm:$0xff]  ;;  %v652_v0 = vld [vmem:[#allocation7 + $0x40] sm:$0xff] }
  0x6c   : > { %565 = vmatpush1.bf16.msra.mxu0 %v1233_v17  ;;  %1040 = vmatprep.subr.bf16.mxu1 %v1262_v25  ;;  %v1280_v63 = vld [vmem:[#allocation5 + $0xc4] ss:$12 sps:$4 sm:$0xff]   ;;  %v667_v1 = vld [vmem:[#allocation7 + $0xb8] sm:$0xff]  ;;  %v1282_v3 = vld [vmem:[#allocation5 + $0xc0] ss:$12 sps:$4 sm:$0xff]   ;;  %p1376_p3 = por %p1375_p12, %p1374_p6 }
  0x6d   : > { %566 = vmatprep.subr.bf16.mxu0 %v1234_v18  ;;  %v651_v2 = vld [vmem:[#allocation7 + $0x38] sm:$0xff]  ;;  %v666_v4 = vld [vmem:[#allocation7 + $0xb0] sm:$0xff]  ;;  %v689_v7 = vld [vmem:[#allocation7 + $0x168] sm:$0xff] }
  0x6e   : > { %v691_v5 = vld [vmem:[#allocation7 + $0x178] sm:$0xff]  ;;  %v690_v6 = vld [vmem:[#allocation7 + $0x170] sm:$0xff]  ;;  %v688_v8 = vld [vmem:[#allocation7 + $0x160] sm:$0xff]  ;;  %p1377_p9 = pnand %p1376_p3, %p1370_p2 }
  0x6f   : > { %1041 = vmatpush3.bf16.msra.mxu1 %v1263_v28  ;;  %v687_v9 = vld [vmem:[#allocation7 + $0x158] sm:$0xff]  ;;  %v686_v10 = vld [vmem:[#allocation7 + $0x150] sm:$0xff]  ;;  %v685_v11 = vld [vmem:[#allocation7 + $0x148] sm:$0xff] }
  0x70   : > { %567 = vmatpush1.bf16.msra.mxu0 %v1236_v21  ;;  %1042 = vmatprep.subr.bf16.mxu1 %v1267_v29  ;;  %v684_v12 = vld [vmem:[#allocation7 + $0x140] sm:$0xff]  ;;  %v683_v13 = vld [vmem:[#allocation7 + $0x138] sm:$0xff]  ;;  %v682_v14 = vld [vmem:[#allocation7 + $0x130] sm:$0xff] }
  0x71   : > { %568 = vmatprep.subr.bf16.mxu0 %v1239_v23  ;;  %v681_v15 = vld [vmem:[#allocation7 + $0x128] sm:$0xff]  ;;  %v650_v16 = vld [vmem:[#allocation7 + $0x30] sm:$0xff]  ;;  %v680_v18 = vld [vmem:[#allocation7 + $0x120] sm:$0xff] }
  0x72   : > { %v665_v17 = vld [vmem:[#allocation7 + $0xa8] sm:$0xff]  ;;  %v664_v20 = vld [vmem:[#allocation7 + $0xa0] sm:$0xff]  ;;  %v679_v21 = vld [vmem:[#allocation7 + $0x118] sm:$0xff] }
  0x73   : > { %1043 = vmatpush3.bf16.msra.mxu1 %v1268_v32  ;;  %v649_v19 = vld [vmem:[#allocation7 + $0x28] sm:$0xff]  ;;  %v648_v22 = vld [vmem:[#allocation7 + $0x20] sm:$0xff]  ;;  %v663_v23 = vld [vmem:[#allocation7 + $0x98] sm:$0xff] }
  0x74   : > { %569 = vmatpush1.bf16.msra.mxu0 %v1241_v26  ;;  %1044 = vmatprep.subr.bf16.mxu1 %v1272_v33  ;;  %v678_v24 = vld [vmem:[#allocation7 + $0x110] sm:$0xff]  ;;  %v647_v25 = vld [vmem:[#allocation7 + $0x18] sm:$0xff]  ;;  %v661_v29 = vld [vmem:[#allocation7 + $0x88] sm:$0xff] }
  0x75   : > { %570 = vmatprep.subr.bf16.mxu0 %v1244_v27  ;;  %v662_v26 = vld [vmem:[#allocation7 + $0x90] sm:$0xff]  ;;  %v677_v27 = vld [vmem:[#allocation7 + $0x108] sm:$0xff]  ;;  %v660_v32 = vld [vmem:[#allocation7 + $0x80] sm:$0xff] }
  0x76   : > { %v646_v28 = vld [vmem:[#allocation7 + $0x10] sm:$0xff]  ;;  %v644_v33 = vld [vmem:[#allocation7] sm:$0xff] }
  0x77   : > { %1045 = vmatpush3.bf16.msra.mxu1 %v1273_v37 }
  0x78   : > { %571 = vmatpush2.bf16.msra.mxu0 %v1246_v30  ;;  %1052 = vmatprep.subr.mxu1 %v675_v39  ;;  %v676_v30 = vld [vmem:[#allocation7 + $0x100] sm:$0xff] }
  0x79   : > { %572 = vmatprep.subr.bf16.mxu0 %v1249_v31  ;;  %v645_v31 = vld [vmem:[#allocation7 + $0x8] sm:$0xff] }
  0x7a   : > { %630 = vmatmul.mubr.bf16.vlgmr.msra.gmra.mxu1 %v1276_v41 }
  0x7b   : > { %1053 = vmatpush3.msra.mxu1 %v659_v42 }
  0x7c   : > { %573 = vmatpush2.bf16.msra.mxu0 %v1251_v34  ;;  %1054 = vmatprep.subr.mxu1 %v674_v44 }
  0x7d   : > { %574 = vmatprep.subr.bf16.mxu0 %v1254_v35  ;;  %1055 = vmatpush3.msra.mxu1 %v658_v46 }
  0x7e   : > { %1056 = vmatprep.subr.mxu1 %v673_v47 }
  0x7f   : > { %1057 = vmatpush3.msra.mxu1 %v657_v48 }
  0x80   : > { %575 = vmatpush2.bf16.msra.mxu0 %v1256_v38  ;;  %1058 = vmatprep.subr.mxu1 %v672_v50 }
  0x81   : > { %576 = vmatprep.subr.bf16.mxu0 %v1259_v40  ;;  %1059 = vmatpush3.msra.mxu1 %v656_v52 }
  0x82   : > { %1060 = vmatprep.subr.mxu1 %v671_v53 }
  0x83   : > { %1061 = vmatpush3.msra.mxu1 %v655_v54 }
  0x84   : > { %577 = vmatpush2.bf16.msra.mxu0 %v1261_v43  ;;  %1062 = vmatprep.subr.mxu1 %v670_v56 }
  0x85   : > { %578 = vmatprep.subr.bf16.mxu0 %v1264_v45  ;;  %1063 = vmatpush3.msra.mxu1 %v654_v58 }
  0x86   : > { %1064 = vmatprep.subr.mxu1 %v669_v59 }
  0x87   : > { %1065 = vmatpush3.msra.mxu1 %v653_v60 }
  0x88   : > { %579 = vmatpush2.bf16.msra.mxu0 %v1266_v49  ;;  %1066 = vmatprep.subr.mxu1 %v668_v62 }
  0x89   : > { %580 = vmatprep.subr.bf16.mxu0 %v1269_v51  ;;  %1067 = vmatpush3.msra.mxu1 %v652_v0 }
  0x8a   : > { %1068 = vmatprep.subr.mxu1 %v667_v1 }
  0x8b   : > { %1069 = vmatpush3.msra.mxu1 %v651_v2 }
  0x8c   : > { %581 = vmatpush2.bf16.msra.mxu0 %v1271_v55  ;;  %1070 = vmatprep.subr.mxu1 %v666_v4 }
  0x8d   : > { %582 = vmatprep.subr.bf16.mxu0 %v1274_v57  ;;  %1071 = vmatpush3.msra.mxu1 %v650_v16 }
  0x8e   : > { %1072 = vmatprep.subr.mxu1 %v665_v17 }
  0x8f   : > { %1073 = vmatpush3.msra.mxu1 %v649_v19 }
  0x90   : > { %583 = vmatpush2.bf16.msra.mxu0 %v1279_v61  ;;  %1074 = vmatprep.subr.mxu1 %v664_v20 }
  0x91   : > { %584 = vmatprep.subr.bf16.mxu0 %v1280_v63  ;;  %1075 = vmatpush3.msra.mxu1 %v648_v22 }
  0x92   : > { %1076 = vmatprep.subr.mxu1 %v663_v23 }
  0x93   : > { %1077 = vmatpush3.msra.mxu1 %v647_v25 }
  0x94   : > { %585 = vmatpush2.bf16.msra.mxu0 %v1282_v3  ;;  %1078 = vmatprep.subr.mxu1 %v662_v26 }
  0x95   : > { %1108 = vmatprep.subr.mxu0 %v691_v5  ;;  %1079 = vmatpush3.msra.mxu1 %v646_v28 }
  0x96   : > { %1080 = vmatprep.subr.mxu1 %v661_v29 }
  0x97   : > { %587 = vmatmul.mubr.bf16.vlgmr.msra.gmra.mxu0 %v1276_v41  ;;  %1081 = vmatpush3.msra.mxu1 %v645_v31 }
  0x98   : > { %1109 = vmatpush3.msra.mxu0 %v691_v5  ;;  %1082 = vmatprep.subr.mxu1 %v660_v32 }
  0x99   : > { %1110 = vmatprep.subr.mxu0 %v690_v6  ;;  %1083 = vmatpush3.msra.mxu1 %v644_v33 }
  0x9a   : > { %1111 = vmatpush3.msra.mxu0 %v690_v6 }
  0x9b   : > { %1112 = vmatprep.subr.mxu0 %v689_v7 }
  0x9c   : > { %1113 = vmatpush3.msra.mxu0 %v689_v7 }
  0x9d   : > { %1114 = vmatprep.subr.mxu0 %v688_v8 }
  0x9e   : > { %1115 = vmatpush3.msra.mxu0 %v688_v8 }
  0x9f   : > { %1116 = vmatprep.subr.mxu0 %v687_v9 }
  0xa0   : > { %1117 = vmatpush3.msra.mxu0 %v687_v9 }
  0xa1   : > { %1118 = vmatprep.subr.mxu0 %v686_v10 }
  0xa2   : > { %1119 = vmatpush3.msra.mxu0 %v686_v10 }
  0xa3   : > { %1120 = vmatprep.subr.mxu0 %v685_v11 }
  0xa4   : > { %1121 = vmatpush3.msra.mxu0 %v685_v11 }
  0xa5   : > { %1122 = vmatprep.subr.mxu0 %v684_v12 }
  0xa6   : > { %1123 = vmatpush3.msra.mxu0 %v684_v12 }
  0xa7   : > { %1124 = vmatprep.subr.mxu0 %v683_v13 }
  0xa8   : > { %1125 = vmatpush3.msra.mxu0 %v683_v13 }
  0xa9   : > { %1126 = vmatprep.subr.mxu0 %v682_v14 }
  0xaa   : > { %1127 = vmatpush3.msra.mxu0 %v682_v14 }
  0xab   : > { %1128 = vmatprep.subr.mxu0 %v681_v15 }
  0xac   : > { %1129 = vmatpush3.msra.mxu0 %v681_v15 }
  0xad   : > { %1130 = vmatprep.subr.mxu0 %v680_v18 }
  0xae   : > { %1131 = vmatpush3.msra.mxu0 %v680_v18 }
  0xaf   : > { %1132 = vmatprep.subr.mxu0 %v679_v21 }
  0xb0   : > { %1133 = vmatpush3.msra.mxu0 %v679_v21 }
  0xb1   : > { %1134 = vmatprep.subr.mxu0 %v678_v24 }
  0xb2   : > { %1135 = vmatpush3.msra.mxu0 %v678_v24 }
  0xb3   : > { %1136 = vmatprep.subr.mxu0 %v677_v27 }
  0xb4   : > { %1137 = vmatpush3.msra.mxu0 %v677_v27 }
  0xb5   : > { %1138 = vmatprep.subr.mxu0 %v676_v30 }
  0xb6   : > { %1139 = vmatpush3.msra.mxu0 %v676_v30 }
 0x13a   : > { %v1046_v34 = vpop.f32.mrf.mxu1 }
 0x13c   : > { %v1047_v35 = vpop.f32.mrf.mxu1 }
 0x13d   : > { %v1048_v36 = vadd.f32 %v1047_v35, %v1046_v34 }
 0x13e   : > { %v1049_v37 = vpop.f32.mrf.mxu1 }
 0x13f   : > { %v640_v38 = vmul.f32 %v1048_v36, %v1048_v36 }
 0x140   : > { %v1050_v39 = vpop.f32.mrf.mxu1 }
 0x141   : > { %v1051_v40 = vadd.f32 %v1050_v39, %v1049_v37  ;;  %1140 = vmatprep.mubr.f32.mxu0 %v640_v38 }
 0x143   : > { %v643_v41 = vmul.f32 %v1051_v40, %v1051_v40 }
 0x145   : > { %1141 = vmatmul.mubr.f32.vlgmr.msra.gmra.mxu0 %v643_v41 }
 0x157   : > { %v588_v42 = vpop.f32.mrf.mxu0 }
 0x158   : > { %v638_v45 = vmul.f32 %v588_v42, %v588_v42 }
 0x159   : > { %v590_v43 = vpop.f32.mrf.mxu0 }
 0x15a   : > { %v639_v44 = vmul.f32 %v590_v43, %v590_v43 }
 0x15b   : > { %v592_v46 = vpop.f32.mrf.mxu0 }
 0x15c   : > { %756 = vmatprep.mubr.f32.mxu1 %v639_v44  ;;  %v641_v49 = vmul.f32 %v592_v46, %v592_v46 }
 0x15d   : > { %v594_v47 = vpop.f32.mrf.mxu0  ;;  %757 = vmatmul.mubr.f32.vlgmr.msra.gmra.mxu1 %v638_v45 }
 0x15e   : > { %v642_v48 = vmul.f32 %v594_v47, %v594_v47 }
 0x160   : > { %761 = vmatprep.mubr.f32.mxu1 %v642_v48 }
 0x161   : > { %762 = vmatmul.mubr.f32.gmra.mxu1 %v641_v49 }
 0x205   : > { %v1142_v50 = vpop.f32.mrf.mxu0 }
 0x207   : > { %v833_v54 = vpop.f32.mrf.mxu0 }
 0x21d   : > { %v1084_v51 = vpop.f32.mrf.mxu1 }
 0x21f   : > { %v1085_v52 = vpop.f32.mrf.mxu1 }
 0x220   : > { %v1086_v53 = vadd.f32 %v1085_v52, %v1084_v51 }
 0x221   : > { %v1087_v55 = vpop.f32.mrf.mxu1 }
 0x222   : > { %v834_v56 = vadd.f32 %v1086_v53, %v833_v54 }
 0x223   : > { %v1088_v57 = vpop.f32.mrf.mxu1 }
 0x224   : > { %v842_v58 = vmax.f32 %v834_v56, 1e-05  ;;  %v1089_v59 = vadd.f32 %v1088_v57, %v1087_v55 }
 0x226   : > { %1283 = vlog2.f32 %v842_v58  ;;  %v839_v60 = vadd.f32 %v1142_v50, %v1089_v59 }
 0x228   : > { %v843_v61 = vmax.f32 %v839_v60, 1e-05 }
 0x22a   : > { %1285 = vlog2.f32 %v843_v61 }
 0x233   : > { %v1284_v62 = vpop.eup %1283 }
 0x234   : > { %v845_v63 = vmul.f32 0.6931472, %v1284_v62 }
 0x236   : > { %v848_v0 = vmul.f32 0.4342945, %v845_v63 }
 0x237   : > { %v1286_v1 = vpop.eup %1285 }
 0x238   : > { %850 = vst [vmem:[%s218_s20] sm:$0xff] %v848_v0  ;;  %v847_v2 = vmul.f32 0.6931472, %v1286_v1 }
 0x23a   : > { %v849_v3 = vmul.f32 0.4342945, %v847_v2 }
 0x23c   : > { %851 = vst [vmem:[%s218_s20 + $0x8] sm:$0xff] %v849_v3 }
 0x23d   : > { %1380 = shalt.err (!%p1377_p9)
}
 0x23e   : > { %s1381_s22 = scalar_lea.hbm %s1624_s29, 256  ;;  %s1385_s28 = scalar_lea.hbm %s1672_s3, 512 }
 0x23f   : > { %p1382_p13 = scmp.ne.s32.totalorder %s1624_s29, %s1381_s22  ;;  %p1386_p4 = scmp.lt.s32.totalorder %s1624_s29, %s1672_s3 }
 0x240   : > { %p1387_p8 = scmp.lt.s32.totalorder %s1385_s28, %s1381_s22 }
 0x241   : > { %p1383_p5 = pnand %p1382_p13, %p1688_p10 }
 0x242   : > { %p1388_p7 = por %p1387_p8, %p1386_p4 }
 0x243   : > { %p1384_p0 = pneg %p1383_p5 }
 0x245   : > { %p1389_p11 = pnand %p1388_p7, %p1384_p0 }
 0x247   : > { %1392 = shalt.err (!%p1389_p11)
}
 0x248   : > { %s1445_s30 = smov 128   ;;  %s1446_s18 = smov 8  }
 0x249   : > { %1153 = dma.vmem_to_hbm [thread:$0]  (%p1688_p10), %s1626_s5, 256, %s1624_s29, %s853_s4, %s1445_s30, %s1445_s30, %s1446_s18  }
 0x24a PF: > { %s881_s20 = sand.u32 1, %s1423_s12   ;;  %p1689_p1 = scmp.ne.s32.totalorder %s1678_s19, 0 }
 0x24b   : > { %p1690_p2 = scmp.ge.s32.totalorder %s1435_s15, 2  ;;  %s882_s6 = scalar_lea.sflag [#allocation4], %s881_s20 }
 0x24d   : > { %p1167_p6 = pnand %p1690_p2, %p1689_p1 }
 0x24f   : > { %p1168_p12 = pneg %p1167_p6 }
 0x251   : > { %1418 = dma.done.wait (%p1168_p12), %s882_s6, 256  }
 0x252   : > { %1420 = vsyncadd (%p1168_p12), %s882_s6, 4294967040  ;;  %p17_p3 = scmp.ge.s32.totalorder %s1542_s9, 4   ;;  %s1691_s12 = smov %s1427_s13 }
 0x253   : > { %s1692_s13 = smov %s1431_s14  ;;  %s1693_s14 = smov %s1551_s17 }
 0x254   : > { %s1694_s15 = smov %s1542_s9  ;;  %19 = sbr.rel (!%p17_p3) target bundleno = 6 (0x6), region = 85 }
 0x259   :  { %887 = vsyncpa [#allocation3], 1 }
 0x25a   :  { %889 = vsyncpa [#allocation3 + $0x1], 1 }
 0x25b   :  { %890 = vsyncpa [#allocation6], 1 }
 0x25c   :  { %891 = vsyncpa [#allocation4], 1 }
 0x25d   :  { %893 = vsyncpa [#allocation4 + $0x1], 1 }

</bundles_post_ra>
